<compile_context>
chip_gen: v7x
topology: tpu7x:2x2x1
jax: 0.10.0
libtpu: 0.0.40
codegen_flags: <defaults>
</compile_context>

<pallas_src>
import functools
import math

import jax
import jax.numpy as jnp
from jax.experimental import pallas as pl
from jax.experimental.pallas import tpu as pltpu


def _round_up(x, m):
    return ((x + m - 1) // m) * m


def _topk_nca_rows_kernel(x_ref, loss_ref, *, k):
    """Per-row -log(sum of top-k along lanes) for one (block_rows, D) tile."""
    x = x_ref[...].astype(jnp.float32)                        # (rows, D)
    rows, d = x.shape
    col = jax.lax.broadcasted_iota(jnp.int32, (rows, d), 1)
    neg_inf = jnp.float32(-jnp.inf)

    top_sum = jnp.zeros((rows, 1), jnp.float32)
    for step in range(k):                                     # k small & static
        m = jnp.max(x, axis=-1, keepdims=True)                # exact max (XLU)
        top_sum = top_sum + m
        if step + 1 < k:
            # First occurrence of the max: exact torch.topk duplicate handling.
            first_idx = jnp.min(jnp.where(x == m, col, d),
                                axis=-1, keepdims=True)
            x = jnp.where(col == first_idx, neg_inf, x)

    # NOTE: -log(top_sum) is NaN/inf if top_sum <= 0 — same precondition as the
    # reference module (NCA-style strictly positive scores).
    loss_ref[...] = -jnp.log(top_sum)


def topk_nca_loss(inputs, k, *, dim=-1, reduction="mean", block_rows=None,
                  interpret=False):
    """TopKNCALoss forward.  k must be a static Python int."""
    if k <= 0:
        raise ValueError("k must be a positive static integer")
    x = jnp.moveaxis(jnp.asarray(inputs), dim, -1)
    batch_shape = x.shape[:-1]
    d = x.shape[-1]
    if k > d:
        raise ValueError(f"k={k} exceeds reduced-dim size {d}")
    n = int(math.prod(batch_shape))
    x2 = x.reshape(n, d)

    if block_rows is None:
        # Largest row tile (<=1024) keeping ~6 live f32 copies of the tile
        # (double-buffered input + in-kernel temporaries) under ~24 MiB, i.e.
        # comfortably inside v7x's 64 MiB VMEM (v5e/v6e have 128 MiB).
        budget_rows = (24 * 1024 * 1024) // (6 * 4 * d)
        block_rows = max(8, min(1024, budget_rows))
    block_rows = max(8, (block_rows // 8) * 8)
    block_rows = min(block_rows, _round_up(n, 8))

    n_pad = _round_up(n, block_rows)
    if n_pad != n:
        # Pad rows with 1.0 -> finite per-row loss (-log(k)); masked out below.
        pad = jnp.ones((n_pad - n, d), x2.dtype)
        x2 = jnp.concatenate([x2, pad], axis=0)

    per_row = pl.pallas_call(
        functools.partial(_topk_nca_rows_kernel, k=k),
        out_shape=jax.ShapeDtypeStruct((n_pad, 1), jnp.float32),
        grid_spec=pltpu.PrefetchScalarGridSpec(
            num_scalar_prefetch=0,
            grid=(n_pad // block_rows,),
            in_specs=[pl.BlockSpec((block_rows, d), lambda i: (i, 0))],
            out_specs=pl.BlockSpec((block_rows, 1), lambda i: (i, 0)),
        ),
        compiler_params=pltpu.CompilerParams(
            dimension_semantics=("parallel",),   # shards across TCs on v7x
            vmem_limit_bytes=32 * 1024 * 1024,
        ),
        interpret=interpret,
    )(x2)

    loss_rows = per_row[:n, 0]
    if reduction == "mean":
        return jnp.mean(loss_rows)
    if reduction == "sum":
        return jnp.sum(loss_rows)
    return loss_rows.reshape(batch_shape)


def _reference(inputs, k, dim=-1, reduction="mean"):
    values, _ = jax.lax.top_k(jnp.moveaxis(inputs, dim, -1), k)
    top_sum = jnp.sum(values, axis=-1)
    loss = -jnp.log(top_sum)
    if reduction == "mean":
        return jnp.mean(loss)
    if reduction == "sum":
        return jnp.sum(loss)
    return loss


if __name__ == "__main__":
    key = jax.random.PRNGKey(0)
    k1, k2 = jax.random.split(key)

    # Case 1: default config (reduction='mean'), aligned shapes.
    N, D, K = 64, 128, 5
    x = jax.random.uniform(k1, (N, D), jnp.float32, minval=0.01, maxval=1.0)
    out = jax.block_until_ready(topk_nca_loss(x, K))
    ref = _reference(x, K)
    assert jnp.allclose(out, ref, rtol=1e-5, atol=1e-5), (out, ref)

    # Case 2: ragged N (exercises pad + mask path) with reduction='sum'.
    N2, K2 = 37, 3
    y = jax.random.uniform(k2, (N2, D), jnp.float32, minval=0.01, maxval=1.0)
    out2 = jax.block_until_ready(topk_nca_loss(y, K2, reduction="sum"))
    ref2 = _reference(y, K2, reduction="sum")
    assert jnp.allclose(out2, ref2, rtol=1e-5, atol=1e-5), (out2, ref2)

    print("KERNEL_OK")
</pallas_src>

<mosaic_0001>
module attributes {stable_mosaic.version = 11 : i64} {
  func.func @_topk_nca_rows_kernel(%arg0: i32, %arg1: memref<64x128xf32, #tpu.memory_space<vmem>>, %arg2: memref<64x1xf32, #tpu.memory_space<vmem>>) attributes {dimension_semantics = [#tpu.dimension_semantics<parallel>], iteration_bounds = array<i64: 1>, scalar_prefetch = 0 : i64, scratch_operands = 0 : i64, tpu.core_type = #tpu.core_type<tc>, window_params = [{transform_indices = @transform_0, window_bounds = array<i64: 64, 128>}, {transform_indices = @transform_1, window_bounds = array<i64: 64, 1>}]} {
    %c0 = arith.constant 0 : index
    %c0_0 = arith.constant 0 : index
    %0 = vector.load %arg1[%c0, %c0_0] : memref<64x128xf32, #tpu.memory_space<vmem>>, vector<64x128xf32>
    %1 = tpu.iota {dimensions = array<i32: 1>} : vector<64x128xi32>
    %cst = arith.constant 0.000000e+00 : f32
    %2 = vector.broadcast %cst : f32 to vector<64x1xf32>
    %cst_1 = arith.constant dense<0xFF800000> : vector<64xf32>
    %3 = vector.multi_reduction <maximumf>, %0, %cst_1 [1] : vector<64x128xf32> to vector<64xf32>
    %4 = vector.shape_cast %3 : vector<64xf32> to vector<64x1xf32>
    %5 = arith.addf %2, %4 : vector<64x1xf32>
    %6 = vector.broadcast %4 : vector<64x1xf32> to vector<64x128xf32>
    %7 = arith.cmpf oeq, %0, %6 : vector<64x128xf32>
    %c128_i32 = arith.constant 128 : i32
    %8 = vector.broadcast %c128_i32 : i32 to vector<64x128xi32>
    %9 = arith.select %7, %1, %8 : vector<64x128xi1>, vector<64x128xi32>
    %cst_2 = arith.constant dense<2147483647> : vector<64xi32>
    %10 = vector.multi_reduction <minsi>, %9, %cst_2 [1] : vector<64x128xi32> to vector<64xi32>
    %11 = vector.shape_cast %10 : vector<64xi32> to vector<64x1xi32>
    %12 = vector.broadcast %11 : vector<64x1xi32> to vector<64x128xi32>
    %13 = arith.cmpi eq, %1, %12 : vector<64x128xi32>
    %cst_3 = arith.constant 0xFF800000 : f32
    %14 = vector.broadcast %cst_3 : f32 to vector<64x128xf32>
    %15 = arith.select %13, %14, %0 : vector<64x128xi1>, vector<64x128xf32>
    %cst_4 = arith.constant dense<0xFF800000> : vector<64xf32>
    %16 = vector.multi_reduction <maximumf>, %15, %cst_4 [1] : vector<64x128xf32> to vector<64xf32>
    %17 = vector.shape_cast %16 : vector<64xf32> to vector<64x1xf32>
    %18 = arith.addf %5, %17 : vector<64x1xf32>
    %19 = vector.broadcast %17 : vector<64x1xf32> to vector<64x128xf32>
    %20 = arith.cmpf oeq, %15, %19 : vector<64x128xf32>
    %c128_i32_5 = arith.constant 128 : i32
    %21 = vector.broadcast %c128_i32_5 : i32 to vector<64x128xi32>
    %22 = arith.select %20, %1, %21 : vector<64x128xi1>, vector<64x128xi32>
    %cst_6 = arith.constant dense<2147483647> : vector<64xi32>
    %23 = vector.multi_reduction <minsi>, %22, %cst_6 [1] : vector<64x128xi32> to vector<64xi32>
    %24 = vector.shape_cast %23 : vector<64xi32> to vector<64x1xi32>
    %25 = vector.broadcast %24 : vector<64x1xi32> to vector<64x128xi32>
    %26 = arith.cmpi eq, %1, %25 : vector<64x128xi32>
    %cst_7 = arith.constant 0xFF800000 : f32
    %27 = vector.broadcast %cst_7 : f32 to vector<64x128xf32>
    %28 = arith.select %26, %27, %15 : vector<64x128xi1>, vector<64x128xf32>
    %cst_8 = arith.constant dense<0xFF800000> : vector<64xf32>
    %29 = vector.multi_reduction <maximumf>, %28, %cst_8 [1] : vector<64x128xf32> to vector<64xf32>
    %30 = vector.shape_cast %29 : vector<64xf32> to vector<64x1xf32>
    %31 = arith.addf %18, %30 : vector<64x1xf32>
    %32 = vector.broadcast %30 : vector<64x1xf32> to vector<64x128xf32>
    %33 = arith.cmpf oeq, %28, %32 : vector<64x128xf32>
    %c128_i32_9 = arith.constant 128 : i32
    %34 = vector.broadcast %c128_i32_9 : i32 to vector<64x128xi32>
    %35 = arith.select %33, %1, %34 : vector<64x128xi1>, vector<64x128xi32>
    %cst_10 = arith.constant dense<2147483647> : vector<64xi32>
    %36 = vector.multi_reduction <minsi>, %35, %cst_10 [1] : vector<64x128xi32> to vector<64xi32>
    %37 = vector.shape_cast %36 : vector<64xi32> to vector<64x1xi32>
    %38 = vector.broadcast %37 : vector<64x1xi32> to vector<64x128xi32>
    %39 = arith.cmpi eq, %1, %38 : vector<64x128xi32>
    %cst_11 = arith.constant 0xFF800000 : f32
    %40 = vector.broadcast %cst_11 : f32 to vector<64x128xf32>
    %41 = arith.select %39, %40, %28 : vector<64x128xi1>, vector<64x128xf32>
    %cst_12 = arith.constant dense<0xFF800000> : vector<64xf32>
    %42 = vector.multi_reduction <maximumf>, %41, %cst_12 [1] : vector<64x128xf32> to vector<64xf32>
    %43 = vector.shape_cast %42 : vector<64xf32> to vector<64x1xf32>
    %44 = arith.addf %31, %43 : vector<64x1xf32>
    %45 = vector.broadcast %43 : vector<64x1xf32> to vector<64x128xf32>
    %46 = arith.cmpf oeq, %41, %45 : vector<64x128xf32>
    %c128_i32_13 = arith.constant 128 : i32
    %47 = vector.broadcast %c128_i32_13 : i32 to vector<64x128xi32>
    %48 = arith.select %46, %1, %47 : vector<64x128xi1>, vector<64x128xi32>
    %cst_14 = arith.constant dense<2147483647> : vector<64xi32>
    %49 = vector.multi_reduction <minsi>, %48, %cst_14 [1] : vector<64x128xi32> to vector<64xi32>
    %50 = vector.shape_cast %49 : vector<64xi32> to vector<64x1xi32>
    %51 = vector.broadcast %50 : vector<64x1xi32> to vector<64x128xi32>
    %52 = arith.cmpi eq, %1, %51 : vector<64x128xi32>
    %cst_15 = arith.constant 0xFF800000 : f32
    %53 = vector.broadcast %cst_15 : f32 to vector<64x128xf32>
    %54 = arith.select %52, %53, %41 : vector<64x128xi1>, vector<64x128xf32>
    %cst_16 = arith.constant dense<0xFF800000> : vector<64xf32>
    %55 = vector.multi_reduction <maximumf>, %54, %cst_16 [1] : vector<64x128xf32> to vector<64xf32>
    %56 = vector.shape_cast %55 : vector<64xf32> to vector<64x1xf32>
    %57 = arith.addf %44, %56 : vector<64x1xf32>
    %58 = math.log %57 : vector<64x1xf32>
    %cst_17 = arith.constant 0.000000e+00 : f32
    %59 = vector.broadcast %cst_17 : f32 to vector<64x1xf32>
    %60 = arith.subf %59, %58 : vector<64x1xf32>
    %c0_18 = arith.constant 0 : index
    %c0_19 = arith.constant 0 : index
    %61 = vector.load %arg2[%c0_18, %c0_19] : memref<64x1xf32, #tpu.memory_space<vmem>>, vector<64x1xf32>
    tpu.vector_store %arg2[%c0_18, %c0_19], %60 {strides = array<i32>} : memref<64x1xf32, #tpu.memory_space<vmem>>, vector<64x1xf32>,
    return
  }
  func.func @transform_0(%arg0: i32) -> (i32, i32) {
    %c0_i32 = arith.constant 0 : i32
    %c0_i32_0 = arith.constant 0 : i32
    return %arg0, %c0_i32 : i32, i32
  }
  func.func @transform_1(%arg0: i32) -> (i32, i32) {
    %c0_i32 = arith.constant 0 : i32
    %c0_i32_0 = arith.constant 0 : i32
    return %arg0, %c0_i32 : i32, i32
  }
}

</mosaic_0001>

<bundles_post_ra>
// kernel: tpu_custom_call.1
= control target key start
LH: loop header
LB: loop body
LE: loop exit
PB: predicated region body
PF: predicated region fallthrough
CT: control target
= control target key end

     0   :  { %6 = vsyncpa [#allocation3], 0  ;;  %s809_s6 = smov [#allocation2]   ;;  %s1208_s0 = inlined_call_operand.hbm [shape: f32[64,128], index: 0, kind: input, shape index: {}]   ;;  %s1209_s1 = inlined_call_operand.vmem [shape: f32[64,1], index: 1, kind: output, shape index: {}]  }
   0x1   :  { %s12_s7 = sshll.u32 %s809_s6, 4  ;;  %s785_s10 = scalar_lea.hbm %s1208_s0, 1024  ;;  %s13_s7 = int_to_ptr.vmem [resolvable:$true] %s12_s7 }
   0x2   :  { %p786_p0 = scmp.ne.s32.totalorder %s1208_s0, %s785_s10  ;;  %p789_p1 = scmp.lt.u32.totalorder %s785_s10, %s1208_s0 }
   0x4   :  { %p791_p2 = pnand %p789_p1, %p786_p0 }
   0x6   :  { %794 = shalt.err (!%p791_p2)
}
   0x7   :  { %s795_s15 = scalar_lea.vmem %s13_s7, 1024  ;;  %p800_p4 = scmp.lt.s32.totalorder %s13_s7, %s13_s7 }
   0x8   :  { %p796_p3 = scmp.ne.s32.totalorder %s13_s7, %s795_s15  ;;  %p801_p5 = scmp.lt.s32.totalorder %s795_s15, %s795_s15 }
   0xa   :  { %p802_p6 = por %p801_p5, %p800_p4 }
   0xc   :  { %p803_p7 = pnand %p802_p6, %p796_p3 }
   0xe   :  { %806 = shalt.err (!%p803_p7)
}
   0xf   :  { %s810_s16 = smov 128   ;;  %s811_s17 = smov 8  }
  0x10   :  { %18 = dma.hbm_to_vmem [thread:$0]  %s1208_s0, 1024, %s13_s7, [#allocation3], %s810_s16, %s810_s16, %s811_s17  }
  0x11   :  { %807 = dma.done.wait [#allocation3], 1024  }
  0x12   :  { %808 = vsyncadd [#allocation3], 4294966272  ;;  %v834_v0 = vld [vmem:[#allocation2] sm:$0xff]  ;;  %v836_v1 = vld [vmem:[#allocation2 + $0x10] sm:$0xff]  ;;  %v30_v8 = vlaneseq }
  0x13   :  { %32 = vmax.xlane.f32.xlu0 %v834_v0  ;;  %36 = vmax.xlane.f32.xlu1 %v836_v1  ;;  %v840_v2 = vld [vmem:[#allocation2 + $0x8] sm:$0xff]  ;;  %v842_v3 = vld [vmem:[#allocation2 + $0x18] sm:$0xff]  ;;  %v846_v4 = vld [vmem:[#allocation2 + $0x20] sm:$0xff] }
  0x14   :  { %v848_v5 = vld [vmem:[#allocation2 + $0x28] sm:$0xff]  ;;  %v852_v6 = vld [vmem:[#allocation2 + $0x30] sm:$0xff]  ;;  %v854_v7 = vld [vmem:[#allocation2 + $0x38] sm:$0xff]  ;;  %v858_v9 = vand.u32 127, %v30_v8 }
  0x17   :  { %34 = vmax.xlane.f32.xlu0 %v840_v2  ;;  %38 = vmax.xlane.f32.xlu1 %v842_v3 }
  0x1b   :  { %40 = vmax.xlane.f32.xlu0 %v846_v4  ;;  %42 = vmax.xlane.f32.xlu1 %v848_v5 }
  0x1f   :  { %44 = vmax.xlane.f32.xlu0 %v852_v6  ;;  %46 = vmax.xlane.f32.xlu1 %v854_v7 }
  0xa0   :  { %v860_v10 = vpop.xlane.xlu0 %32  ;;  %v862_v11 = vpop.xlane.xlu1 %36 }
  0xa1   :  { %vm56_vm0 = vcmp.eq.f32.partialorder %v834_v0, %v860_v10  ;;  %vm58_vm1 = vcmp.eq.f32.partialorder %v836_v1, %v862_v11 }
  0xa2   :  { %v64_v12 = vsel %vm56_vm0, %v858_v9, 128  ;;  %v66_v13 = vsel %vm58_vm1, %v858_v9, 128 }
  0xa3   :  { %v73_v14 = vshra.s32 %v64_v12, 16  ;;  %v101_v15 = vshra.s32 %v66_v13, 16  ;;  %v72_v42 = vand.u32 65535, %v64_v12  ;;  %v100_v46 = vand.u32 65535, %v66_v13 }
  0xa4   :  { %v870_v16 = vpop.xlane.xlu0 %34  ;;  %v872_v17 = vpop.xlane.xlu1 %38 }
  0xa5   :  { %vm57_vm2 = vcmp.eq.f32.partialorder %v840_v2, %v870_v16  ;;  %v75_v18 = vcvt.s32.f32 %v73_v14  ;;  %vm59_vm3 = vcmp.eq.f32.partialorder %v842_v3, %v872_v17  ;;  %v103_v21 = vcvt.s32.f32 %v101_v15 }
  0xa6   :  { %v65_v19 = vsel %vm57_vm2, %v858_v9, 128  ;;  %v67_v20 = vsel %vm59_vm3, %v858_v9, 128  ;;  %v74_v44 = vcvt.s32.f32 %v72_v42  ;;  %v102_v51 = vcvt.s32.f32 %v100_v46 }
  0xa7   :  { %76 = vmin.xlane.f32.xlu0 %v75_v18  ;;  %v87_v22 = vshra.s32 %v65_v19, 16  ;;  %v115_v23 = vshra.s32 %v67_v20, 16  ;;  %v86_v45 = vand.u32 65535, %v65_v19  ;;  %v114_v52 = vand.u32 65535, %v67_v20 }
  0xa8   :  { %v880_v24 = vpop.xlane.xlu0 %40  ;;  %v882_v25 = vpop.xlane.xlu1 %42 }
  0xa9   :  { %vm60_vm4 = vcmp.eq.f32.partialorder %v846_v4, %v880_v24  ;;  %v89_v26 = vcvt.s32.f32 %v87_v22  ;;  %vm61_vm5 = vcmp.eq.f32.partialorder %v848_v5, %v882_v25  ;;  %v117_v29 = vcvt.s32.f32 %v115_v23 }
  0xaa   :  { %v68_v27 = vsel %vm60_vm4, %v858_v9, 128  ;;  %v69_v28 = vsel %vm61_vm5, %v858_v9, 128  ;;  %v88_v50 = vcvt.s32.f32 %v86_v45  ;;  %v116_v58 = vcvt.s32.f32 %v114_v52 }
  0xab   :  { %104 = vmin.xlane.f32.xlu0 %v103_v21  ;;  %90 = vmin.xlane.f32.xlu1 %v89_v26  ;;  %v129_v30 = vshra.s32 %v68_v27, 16  ;;  %v143_v31 = vshra.s32 %v69_v28, 16  ;;  %v128_v53 = vand.u32 65535, %v68_v27  ;;  %v142_v60 = vand.u32 65535, %v69_v28 }
  0xac   :  { %v890_v32 = vpop.xlane.xlu0 %44  ;;  %v892_v33 = vpop.xlane.xlu1 %46 }
  0xad   :  { %vm62_vm6 = vcmp.eq.f32.partialorder %v852_v6, %v890_v32  ;;  %v131_v34 = vcvt.s32.f32 %v129_v30  ;;  %vm63_vm7 = vcmp.eq.f32.partialorder %v854_v7, %v892_v33  ;;  %v145_v37 = vcvt.s32.f32 %v143_v31 }
  0xae   :  { %v70_v35 = vsel %vm62_vm6, %v858_v9, 128  ;;  %v71_v36 = vsel %vm63_vm7, %v858_v9, 128  ;;  %v130_v59 = vcvt.s32.f32 %v128_v53  ;;  %v144_v13 = vcvt.s32.f32 %v142_v60 }
  0xaf   :  { %118 = vmin.xlane.f32.xlu1 %v117_v29  ;;  %132 = vmin.xlane.f32.xlu0 %v131_v34  ;;  %v157_v38 = vshra.s32 %v70_v35, 16  ;;  %v171_v39 = vshra.s32 %v71_v36, 16  ;;  %v156_v61 = vand.u32 65535, %v70_v35  ;;  %v170_v15 = vand.u32 65535, %v71_v36 }
  0xb1   :  { %v159_v40 = vcvt.s32.f32 %v157_v38  ;;  %v173_v41 = vcvt.s32.f32 %v171_v39  ;;  %v158_v14 = vcvt.s32.f32 %v156_v61 }
  0xb3   :  { %146 = vmin.xlane.f32.xlu1 %v145_v37  ;;  %160 = vmin.xlane.f32.xlu0 %v159_v40 }
  0xb7   :  { %174 = vmin.xlane.f32.xlu1 %v173_v41 }
 0x134   :  { %v77_v43 = vpop.xlane.xlu0 %76 }
 0x135   :  { %vm78_vm8 = vcmp.eq.f32.partialorder %v75_v18, %v77_v43  ;;  %v83_v23 = vcvt.f32.s32 %v77_v43 }
 0x136   :  { %v79_v47 = vsel %vm78_vm8, %v74_v44, inf }
 0x137   :  { %80 = vmin.xlane.f32.xlu0 %v79_v47  ;;  %v84_v28 = vshll.u32 %v83_v23, 16 }
 0x138   :  { %v91_v48 = vpop.xlane.xlu1 %90  ;;  %v105_v49 = vpop.xlane.xlu0 %104 }
 0x139   :  { %vm92_vm9 = vcmp.eq.f32.partialorder %v89_v26, %v91_v48  ;;  %vm106_vm10 = vcmp.eq.f32.partialorder %v103_v21, %v105_v49  ;;  %v172_v21 = vcvt.s32.f32 %v170_v15  ;;  %v97_v26 = vcvt.f32.s32 %v91_v48 }
 0x13a   :  { %v93_v54 = vsel %vm92_vm9, %v88_v50, inf  ;;  %v107_v55 = vsel %vm106_vm10, %v102_v51, inf }
 0x13b   :  { %94 = vmin.xlane.f32.xlu1 %v93_v54  ;;  %108 = vmin.xlane.f32.xlu0 %v107_v55 }
 0x13c   :  { %v119_v56 = vpop.xlane.xlu1 %118  ;;  %v133_v57 = vpop.xlane.xlu0 %132 }
 0x13d   :  { %vm120_vm11 = vcmp.eq.f32.partialorder %v117_v29, %v119_v56  ;;  %vm134_vm12 = vcmp.eq.f32.partialorder %v131_v34, %v133_v57  ;;  %v111_v29 = vcvt.f32.s32 %v105_v49  ;;  %v98_v34 = vshll.u32 %v97_v26, 16 }
 0x13e   :  { %v121_v62 = vsel %vm120_vm11, %v116_v58, inf  ;;  %v135_v63 = vsel %vm134_vm12, %v130_v59, inf  ;;  %v125_v35 = vcvt.f32.s32 %v119_v56  ;;  %v139_v36 = vcvt.f32.s32 %v133_v57 }
 0x13f   :  { %122 = vmin.xlane.f32.xlu1 %v121_v62  ;;  %136 = vmin.xlane.f32.xlu0 %v135_v63  ;;  %v112_v39 = vshll.u32 %v111_v29, 16 }
 0x140   :  { %v147_v8 = vpop.xlane.xlu1 %146  ;;  %v161_v12 = vpop.xlane.xlu0 %160  ;;  %v126_v45 = vshll.u32 %v125_v35, 16  ;;  %v140_v46 = vshll.u32 %v139_v36, 16 }
 0x141   :  { %vm148_vm13 = vcmp.eq.f32.partialorder %v145_v37, %v147_v8  ;;  %vm162_vm14 = vcmp.eq.f32.partialorder %v159_v40, %v161_v12  ;;  %v153_v47 = vcvt.f32.s32 %v147_v8  ;;  %v167_v48 = vcvt.f32.s32 %v161_v12 }
 0x142   :  { %v149_v18 = vsel %vm148_vm13, %v144_v13, inf  ;;  %v163_v19 = vsel %vm162_vm14, %v158_v14, inf }
 0x143   :  { %150 = vmin.xlane.f32.xlu1 %v149_v18  ;;  %164 = vmin.xlane.f32.xlu0 %v163_v19  ;;  %v154_v56 = vshll.u32 %v153_v47, 16  ;;  %v168_v57 = vshll.u32 %v167_v48, 16 }
 0x144   :  { %v175_v20 = vpop.xlane.xlu1 %174 }
 0x145   :  { %vm176_vm15 = vcmp.eq.f32.partialorder %v173_v41, %v175_v20  ;;  %v181_v58 = vcvt.f32.s32 %v175_v20 }
 0x146   :  { %v177_v22 = vsel %vm176_vm15, %v172_v21, inf }
 0x147   :  { %178 = vmin.xlane.f32.xlu1 %v177_v22  ;;  %v182_v13 = vshll.u32 %v181_v58, 16 }
 0x1c4   :  { %v81_v27 = vpop.xlane.xlu0 %80 }
 0x1c5   :  { %v82_v30 = vcvt.f32.s32 %v81_v27 }
 0x1c7   :  { %v85_v31 = vadd.s32 %v84_v28, %v82_v30 }
 0x1c8   :  { %v95_v37 = vpop.xlane.xlu1 %94  ;;  %v109_v38 = vpop.xlane.xlu0 %108 }
 0x1c9   :  { %v96_v40 = vcvt.f32.s32 %v95_v37  ;;  %v110_v42 = vcvt.f32.s32 %v109_v38  ;;  %vm184_vm0 = vcmp.eq.s32.totalorder %v858_v9, %v85_v31 }
 0x1ca   :  { %v902_v41 = vsel %vm184_vm0, -inf, %v834_v0 }
 0x1cb   :  { %v99_v43 = vadd.s32 %v98_v34, %v96_v40  ;;  %v113_v44 = vadd.s32 %v112_v39, %v110_v42  ;;  %200 = vmax.xlane.f32.xlu0 %v902_v41 }
 0x1cc   :  { %v123_v49 = vpop.xlane.xlu1 %122  ;;  %v137_v50 = vpop.xlane.xlu0 %136 }
 0x1cd   :  { %v124_v51 = vcvt.f32.s32 %v123_v49  ;;  %v138_v52 = vcvt.f32.s32 %v137_v50  ;;  %vm185_vm1 = vcmp.eq.s32.totalorder %v858_v9, %v99_v43  ;;  %vm186_vm2 = vcmp.eq.s32.totalorder %v858_v9, %v113_v44 }
 0x1ce   :  { %v908_v53 = vsel %vm185_vm1, -inf, %v840_v2  ;;  %v911_v0 = vsel %vm186_vm2, -inf, %v836_v1 }
 0x1cf   :  { %v127_v54 = vadd.s32 %v126_v45, %v124_v51  ;;  %v141_v55 = vadd.s32 %v140_v46, %v138_v52  ;;  %202 = vmax.xlane.f32.xlu1 %v908_v53  ;;  %204 = vmax.xlane.f32.xlu0 %v911_v0 }
 0x1d0   :  { %v151_v59 = vpop.xlane.xlu1 %150  ;;  %v165_v60 = vpop.xlane.xlu0 %164 }
 0x1d1   :  { %v152_v61 = vcvt.f32.s32 %v151_v59  ;;  %v166_v62 = vcvt.f32.s32 %v165_v60  ;;  %vm187_vm3 = vcmp.eq.s32.totalorder %v858_v9, %v127_v54  ;;  %vm188_vm4 = vcmp.eq.s32.totalorder %v858_v9, %v141_v55 }
 0x1d2   :  { %v918_v1 = vsel %vm187_vm3, -inf, %v842_v3  ;;  %v921_v2 = vsel %vm188_vm4, -inf, %v846_v4 }
 0x1d3   :  { %v155_v63 = vadd.s32 %v154_v56, %v152_v61  ;;  %v169_v8 = vadd.s32 %v168_v57, %v166_v62  ;;  %206 = vmax.xlane.f32.xlu1 %v918_v1  ;;  %208 = vmax.xlane.f32.xlu0 %v921_v2 }
 0x1d4   :  { %v179_v12 = vpop.xlane.xlu1 %178 }
 0x1d5   :  { %v180_v14 = vcvt.f32.s32 %v179_v12  ;;  %vm189_vm5 = vcmp.eq.s32.totalorder %v858_v9, %v155_v63  ;;  %vm190_vm6 = vcmp.eq.s32.totalorder %v858_v9, %v169_v8 }
 0x1d6   :  { %v928_v15 = vsel %vm189_vm5, -inf, %v848_v5  ;;  %v931_v3 = vsel %vm190_vm6, -inf, %v852_v6 }
 0x1d7   :  { %v183_v4 = vadd.s32 %v182_v13, %v180_v14  ;;  %210 = vmax.xlane.f32.xlu1 %v928_v15  ;;  %212 = vmax.xlane.f32.xlu0 %v931_v3 }
 0x1d9   :  { %vm191_vm7 = vcmp.eq.s32.totalorder %v858_v9, %v183_v4 }
 0x1da   :  { %v937_v18 = vsel %vm191_vm7, -inf, %v854_v7 }
 0x1db   :  { %214 = vmax.xlane.f32.xlu1 %v937_v18 }
 0x258   :  { %v940_v19 = vpop.xlane.xlu0 %200 }
 0x259   :  { %vm224_vm8 = vcmp.eq.f32.partialorder %v902_v41, %v940_v19 }
 0x25a   :  { %v232_v5 = vsel %vm224_vm8, %v858_v9, 128 }
 0x25b   :  { %v241_v6 = vshra.s32 %v232_v5, 16  ;;  %v240_v54 = vand.u32 65535, %v232_v5 }
 0x25c   :  { %v945_v20 = vpop.xlane.xlu1 %202  ;;  %v947_v21 = vpop.xlane.xlu0 %204 }
 0x25d   :  { %vm225_vm9 = vcmp.eq.f32.partialorder %v908_v53, %v945_v20  ;;  %vm226_vm10 = vcmp.eq.f32.partialorder %v911_v0, %v947_v21  ;;  %v243_v23 = vcvt.s32.f32 %v241_v6  ;;  %v242_v56 = vcvt.s32.f32 %v240_v54 }
 0x25e   :  { %v233_v7 = vsel %vm225_vm9, %v858_v9, 128  ;;  %v234_v22 = vsel %vm226_vm10, %v858_v9, 128 }
 0x25f   :  { %v255_v26 = vshra.s32 %v233_v7, 16  ;;  %v269_v27 = vshra.s32 %v234_v22, 16  ;;  %244 = vmin.xlane.f32.xlu0 %v243_v23  ;;  %v254_v57 = vand.u32 65535, %v233_v7  ;;  %v268_v58 = vand.u32 65535, %v234_v22 }
 0x260   :  { %v955_v28 = vpop.xlane.xlu1 %206  ;;  %v957_v29 = vpop.xlane.xlu0 %208 }
 0x261   :  { %vm227_vm11 = vcmp.eq.f32.partialorder %v918_v1, %v955_v28  ;;  %vm228_vm12 = vcmp.eq.f32.partialorder %v921_v2, %v957_v29  ;;  %v257_v34 = vcvt.s32.f32 %v255_v26  ;;  %v271_v35 = vcvt.s32.f32 %v269_v27 }
 0x262   :  { %v235_v30 = vsel %vm227_vm11, %v858_v9, 128  ;;  %v236_v31 = vsel %vm228_vm12, %v858_v9, 128  ;;  %v256_v62 = vcvt.s32.f32 %v254_v57  ;;  %v270_v63 = vcvt.s32.f32 %v268_v58 }
 0x263   :  { %v283_v36 = vshra.s32 %v235_v30, 16  ;;  %v297_v37 = vshra.s32 %v236_v31, 16  ;;  %258 = vmin.xlane.f32.xlu1 %v257_v34  ;;  %272 = vmin.xlane.f32.xlu0 %v271_v35  ;;  %v282_v8 = vand.u32 65535, %v235_v30  ;;  %v296_v12 = vand.u32 65535, %v236_v31 }
 0x264   :  { %v965_v38 = vpop.xlane.xlu1 %210  ;;  %v967_v39 = vpop.xlane.xlu0 %212 }
 0x265   :  { %vm229_vm13 = vcmp.eq.f32.partialorder %v928_v15, %v965_v38  ;;  %vm230_vm14 = vcmp.eq.f32.partialorder %v931_v3, %v967_v39  ;;  %v285_v43 = vcvt.s32.f32 %v283_v36  ;;  %v299_v44 = vcvt.s32.f32 %v297_v37 }
 0x266   :  { %v237_v40 = vsel %vm229_vm13, %v858_v9, 128  ;;  %v238_v42 = vsel %vm230_vm14, %v858_v9, 128  ;;  %v284_v6 = vcvt.s32.f32 %v282_v8  ;;  %v298_v7 = vcvt.s32.f32 %v296_v12 }
 0x267   :  { %v311_v45 = vshra.s32 %v237_v40, 16  ;;  %v325_v46 = vshra.s32 %v238_v42, 16  ;;  %286 = vmin.xlane.f32.xlu1 %v285_v43  ;;  %300 = vmin.xlane.f32.xlu0 %v299_v44  ;;  %v310_v22 = vand.u32 65535, %v237_v40 }
 0x268   :  { %v975_v47 = vpop.xlane.xlu1 %214 }
 0x269   :  { %vm231_vm15 = vcmp.eq.f32.partialorder %v937_v18, %v975_v47  ;;  %v313_v48 = vcvt.s32.f32 %v311_v45  ;;  %v327_v49 = vcvt.s32.f32 %v325_v46 }
 0x26a   :  { %v239_v50 = vsel %vm231_vm15, %v858_v9, 128 }
 0x26b   :  { %v339_v51 = vshra.s32 %v239_v50, 16  ;;  %314 = vmin.xlane.f32.xlu1 %v313_v48  ;;  %328 = vmin.xlane.f32.xlu0 %v327_v49  ;;  %v338_v36 = vand.u32 65535, %v239_v50 }
 0x26d   :  { %v341_v52 = vcvt.s32.f32 %v339_v51  ;;  %v340_v40 = vcvt.s32.f32 %v338_v36 }
 0x26f   :  { %342 = vmin.xlane.f32.xlu1 %v341_v52 }
 0x2ec   :  { %v245_v55 = vpop.xlane.xlu0 %244 }
 0x2ed   :  { %vm246_vm0 = vcmp.eq.f32.partialorder %v243_v23, %v245_v55  ;;  %v324_v23 = vand.u32 65535, %v238_v42 }
 0x2ee   :  { %v247_v59 = vsel %vm246_vm0, %v242_v56, inf }
 0x2ef   :  { %248 = vmin.xlane.f32.xlu0 %v247_v59 }
 0x2f0   :  { %v259_v60 = vpop.xlane.xlu1 %258  ;;  %v273_v61 = vpop.xlane.xlu0 %272 }
 0x2f1   :  { %vm260_vm1 = vcmp.eq.f32.partialorder %v257_v34, %v259_v60  ;;  %vm274_vm2 = vcmp.eq.f32.partialorder %v271_v35, %v273_v61  ;;  %v312_v34 = vcvt.s32.f32 %v310_v22  ;;  %v326_v35 = vcvt.s32.f32 %v324_v23 }
 0x2f2   :  { %v261_v13 = vsel %vm260_vm1, %v256_v62, inf  ;;  %v275_v14 = vsel %vm274_vm2, %v270_v63, inf  ;;  %v279_v56 = vcvt.f32.s32 %v273_v61 }
 0x2f3   :  { %262 = vmin.xlane.f32.xlu1 %v261_v13  ;;  %276 = vmin.xlane.f32.xlu0 %v275_v14 }
 0x2f4   :  { %v287_v4 = vpop.xlane.xlu1 %286  ;;  %v301_v5 = vpop.xlane.xlu0 %300  ;;  %v280_v63 = vshll.u32 %v279_v56, 16  ;;  %v216_v56 = vadd.f32 %v940_v19, %v860_v10 }
 0x2f5   :  { %vm288_vm3 = vcmp.eq.f32.partialorder %v285_v43, %v287_v4  ;;  %vm302_vm4 = vcmp.eq.f32.partialorder %v299_v44, %v301_v5  ;;  %v251_v43 = vcvt.f32.s32 %v245_v55  ;;  %v265_v44 = vcvt.f32.s32 %v259_v60 }
 0x2f6   :  { %v289_v26 = vsel %vm288_vm3, %v284_v6, inf  ;;  %v303_v27 = vsel %vm302_vm4, %v298_v7, inf  ;;  %v293_v50 = vcvt.f32.s32 %v287_v4 }
 0x2f7   :  { %290 = vmin.xlane.f32.xlu1 %v289_v26  ;;  %304 = vmin.xlane.f32.xlu0 %v303_v27  ;;  %v252_v54 = vshll.u32 %v251_v43, 16  ;;  %v266_v59 = vshll.u32 %v265_v44, 16 }
 0x2f8   :  { %v315_v30 = vpop.xlane.xlu1 %314  ;;  %v329_v31 = vpop.xlane.xlu0 %328  ;;  %v294_v61 = vshll.u32 %v293_v50, 16 }
 0x2f9   :  { %vm316_vm5 = vcmp.eq.f32.partialorder %v313_v48, %v315_v30  ;;  %vm330_vm6 = vcmp.eq.f32.partialorder %v327_v49, %v329_v31  ;;  %v307_v48 = vcvt.f32.s32 %v301_v5  ;;  %v321_v14 = vcvt.f32.s32 %v315_v30 }
 0x2fa   :  { %v317_v37 = vsel %vm316_vm5, %v312_v34, inf  ;;  %v331_v45 = vsel %vm330_vm6, %v326_v35, inf  ;;  %v335_v6 = vcvt.f32.s32 %v329_v31 }
 0x2fb   :  { %318 = vmin.xlane.f32.xlu1 %v317_v37  ;;  %332 = vmin.xlane.f32.xlu0 %v331_v45  ;;  %v308_v13 = vshll.u32 %v307_v48, 16  ;;  %v322_v30 = vshll.u32 %v321_v14, 16 }
 0x2fc   :  { %v343_v46 = vpop.xlane.xlu1 %342  ;;  %v336_v31 = vshll.u32 %v335_v6, 16 }
 0x2fd   :  { %vm344_vm7 = vcmp.eq.f32.partialorder %v341_v52, %v343_v46  ;;  %v349_v34 = vcvt.f32.s32 %v343_v46 }
 0x2fe   :  { %v345_v42 = vsel %vm344_vm7, %v340_v40, inf }
 0x2ff   :  { %346 = vmin.xlane.f32.xlu1 %v345_v42  ;;  %v350_v43 = vshll.u32 %v349_v34, 16 }
 0x37c   :  { %v249_v51 = vpop.xlane.xlu0 %248 }
 0x37d   :  { %v250_v57 = vcvt.f32.s32 %v249_v51 }
 0x37f   :  { %v253_v58 = vadd.s32 %v252_v54, %v250_v57 }
 0x380   :  { %v263_v49 = vpop.xlane.xlu1 %262  ;;  %v277_v62 = vpop.xlane.xlu0 %276 }
 0x381   :  { %v264_v8 = vcvt.f32.s32 %v263_v49  ;;  %v278_v12 = vcvt.f32.s32 %v277_v62  ;;  %vm352_vm8 = vcmp.eq.s32.totalorder %v858_v9, %v253_v58  ;;  %v217_v58 = vadd.f32 %v945_v20, %v870_v16 }
 0x382   :  { %v982_v52 = vsel %vm352_vm8, -inf, %v902_v41  ;;  %v219_v16 = vadd.f32 %v955_v28, %v872_v17 }
 0x383   :  { %v267_v55 = vadd.s32 %v266_v59, %v264_v8  ;;  %v281_v60 = vadd.s32 %v280_v63, %v278_v12  ;;  %368 = vmax.xlane.f32.xlu0 %v982_v52  ;;  %v218_v59 = vadd.f32 %v947_v21, %v862_v11  ;;  %v220_v11 = vadd.f32 %v957_v29, %v880_v24 }
 0x384   :  { %v291_v4 = vpop.xlane.xlu1 %290  ;;  %v305_v5 = vpop.xlane.xlu0 %304  ;;  %v221_v24 = vadd.f32 %v965_v38, %v882_v25 }
 0x385   :  { %v292_v7 = vcvt.f32.s32 %v291_v4  ;;  %v306_v22 = vcvt.f32.s32 %v305_v5  ;;  %vm353_vm9 = vcmp.eq.s32.totalorder %v858_v9, %v267_v55  ;;  %vm354_vm10 = vcmp.eq.s32.totalorder %v858_v9, %v281_v60 }
 0x386   :  { %v988_v23 = vsel %vm353_vm9, -inf, %v908_v53  ;;  %v991_v41 = vsel %vm354_vm10, -inf, %v911_v0 }
 0x387   :  { %v295_v26 = vadd.s32 %v294_v61, %v292_v7  ;;  %v309_v27 = vadd.s32 %v308_v13, %v306_v22  ;;  %370 = vmax.xlane.f32.xlu1 %v988_v23  ;;  %372 = vmax.xlane.f32.xlu0 %v991_v41 }
 0x388   :  { %v319_v35 = vpop.xlane.xlu1 %318  ;;  %v333_v36 = vpop.xlane.xlu0 %332 }
 0x389   :  { %v320_v37 = vcvt.f32.s32 %v319_v35  ;;  %v334_v45 = vcvt.f32.s32 %v333_v36  ;;  %vm355_vm11 = vcmp.eq.s32.totalorder %v858_v9, %v295_v26  ;;  %vm356_vm12 = vcmp.eq.s32.totalorder %v858_v9, %v309_v27 }
 0x38a   :  { %v998_v53 = vsel %vm355_vm11, -inf, %v918_v1  ;;  %v1001_v0 = vsel %vm356_vm12, -inf, %v921_v2 }
 0x38b   :  { %v323_v40 = vadd.s32 %v322_v30, %v320_v37  ;;  %v337_v42 = vadd.s32 %v336_v31, %v334_v45  ;;  %374 = vmax.xlane.f32.xlu1 %v998_v53  ;;  %376 = vmax.xlane.f32.xlu0 %v1001_v0 }
 0x38c   :  { %v347_v46 = vpop.xlane.xlu1 %346 }
 0x38d   :  { %v348_v44 = vcvt.f32.s32 %v347_v46  ;;  %vm357_vm13 = vcmp.eq.s32.totalorder %v858_v9, %v323_v40  ;;  %vm358_vm14 = vcmp.eq.s32.totalorder %v858_v9, %v337_v42 }
 0x38e   :  { %v1008_v51 = vsel %vm357_vm13, -inf, %v928_v15  ;;  %v1011_v1 = vsel %vm358_vm14, -inf, %v931_v3 }
 0x38f   :  { %v351_v2 = vadd.s32 %v350_v43, %v348_v44  ;;  %378 = vmax.xlane.f32.xlu1 %v1008_v51  ;;  %380 = vmax.xlane.f32.xlu0 %v1011_v1 }
 0x391   :  { %vm359_vm15 = vcmp.eq.s32.totalorder %v858_v9, %v351_v2 }
 0x392   :  { %v1017_v54 = vsel %vm359_vm15, -inf, %v937_v18 }
 0x393   :  { %382 = vmax.xlane.f32.xlu1 %v1017_v54 }
 0x410   :  { %v369_v15 = vpop.xlane.xlu0 %368 }
 0x411   :  { %v1022_v57 = vadd.f32 %v369_v15, %v216_v56  ;;  %vm392_vm0 = vcmp.eq.f32.partialorder %v982_v52, %v369_v15 }
 0x412   :  { %v400_v3 = vsel %vm392_vm0, %v858_v9, 128 }
 0x413   :  { %v409_v18 = vshra.s32 %v400_v3, 16  ;;  %v408_v45 = vand.u32 65535, %v400_v3 }
 0x414   :  { %v371_v50 = vpop.xlane.xlu1 %370  ;;  %v373_v48 = vpop.xlane.xlu0 %372 }
 0x415   :  { %v1030_v49 = vadd.f32 %v371_v50, %v217_v58  ;;  %vm393_vm1 = vcmp.eq.f32.partialorder %v988_v23, %v371_v50  ;;  %v1033_v10 = vadd.f32 %v373_v48, %v218_v59  ;;  %vm394_vm2 = vcmp.eq.f32.partialorder %v991_v41, %v373_v48 }
 0x416   :  { %v401_v19 = vsel %vm393_vm1, %v858_v9, 128  ;;  %v402_v62 = vsel %vm394_vm2, %v858_v9, 128  ;;  %v411_v63 = vcvt.s32.f32 %v409_v18  ;;  %v410_v42 = vcvt.s32.f32 %v408_v45 }
 0x417   :  { %v423_v20 = vshra.s32 %v401_v19, 16  ;;  %v437_v21 = vshra.s32 %v402_v62, 16  ;;  %v422_v46 = vand.u32 65535, %v401_v19  ;;  %v436_v43 = vand.u32 65535, %v402_v62 }
 0x418   :  { %412 = vmin.xlane.f32.xlu0 %v411_v63  ;;  %v375_v8 = vpop.xlane.xlu1 %374  ;;  %v377_v12 = vpop.xlane.xlu0 %376 }
 0x419   :  { %v1042_v55 = vadd.f32 %v375_v8, %v219_v16  ;;  %vm395_vm3 = vcmp.eq.f32.partialorder %v998_v53, %v375_v8  ;;  %v1045_v60 = vadd.f32 %v377_v12, %v220_v11  ;;  %vm396_vm4 = vcmp.eq.f32.partialorder %v1001_v0, %v377_v12 }
 0x41a   :  { %v403_v61 = vsel %vm395_vm3, %v858_v9, 128  ;;  %v404_v17 = vsel %vm396_vm4, %v858_v9, 128  ;;  %v425_v28 = vcvt.s32.f32 %v423_v20  ;;  %v439_v13 = vcvt.s32.f32 %v437_v21 }
 0x41b   :  { %v451_v29 = vshra.s32 %v403_v61, 16  ;;  %v465_v14 = vshra.s32 %v404_v17, 16  ;;  %v424_v15 = vcvt.s32.f32 %v422_v46  ;;  %v438_v58 = vcvt.s32.f32 %v436_v43 }
 0x41c   :  { %426 = vmin.xlane.f32.xlu1 %v425_v28  ;;  %440 = vmin.xlane.f32.xlu0 %v439_v13  ;;  %v379_v6 = vpop.xlane.xlu1 %378  ;;  %v1052_v4 = vpop.xlane.xlu0 %380  ;;  %v450_v59 = vand.u32 65535, %v403_v61  ;;  %v464_v18 = vand.u32 65535, %v404_v17 }
 0x41d   :  { %v1054_v5 = vadd.f32 %v379_v6, %v221_v24  ;;  %vm397_vm5 = vcmp.eq.f32.partialorder %v1008_v51, %v379_v6  ;;  %vm398_vm6 = vcmp.eq.f32.partialorder %v1011_v1, %v1052_v4  ;;  %v453_v26 = vcvt.s32.f32 %v451_v29 }
 0x41e   :  { %v405_v7 = vsel %vm397_vm5, %v858_v9, 128  ;;  %v406_v22 = vsel %vm398_vm6, %v858_v9, 128  ;;  %v467_v25 = vcvt.s32.f32 %v465_v14  ;;  %v452_v11 = vcvt.s32.f32 %v450_v59 }
 0x41f   :  { %v479_v38 = vshra.s32 %v405_v7, 16  ;;  %v493_v27 = vshra.s32 %v406_v22, 16  ;;  %v466_v19 = vcvt.s32.f32 %v464_v18  ;;  %v478_v62 = vand.u32 65535, %v405_v7 }
 0x420   :  { %454 = vmin.xlane.f32.xlu1 %v453_v26  ;;  %468 = vmin.xlane.f32.xlu0 %v467_v25  ;;  %v1061_v30 = vpop.xlane.xlu1 %382 }
 0x421   :  { %vm399_vm7 = vcmp.eq.f32.partialorder %v1017_v54, %v1061_v30  ;;  %v481_v31 = vcvt.s32.f32 %v479_v38  ;;  %v495_v34 = vcvt.s32.f32 %v493_v27  ;;  %v480_v61 = vcvt.s32.f32 %v478_v62 }
 0x422   :  { %v407_v35 = vsel %vm399_vm7, %v858_v9, 128 }
 0x423   :  { %v507_v36 = vshra.s32 %v407_v35, 16 }
 0x424   :  { %482 = vmin.xlane.f32.xlu1 %v481_v31  ;;  %496 = vmin.xlane.f32.xlu0 %v495_v34 }
 0x425   :  { %v509_v37 = vcvt.s32.f32 %v507_v36 }
 0x428   :  { %510 = vmin.xlane.f32.xlu1 %v509_v37 }
 0x4a5   :  { %v413_v40 = vpop.xlane.xlu0 %412 }
 0x4a6   :  { %vm414_vm8 = vcmp.eq.f32.partialorder %v411_v63, %v413_v40  ;;  %v492_v63 = vand.u32 65535, %v406_v22  ;;  %v419_v7 = vcvt.f32.s32 %v413_v40 }
 0x4a7   :  { %v415_v44 = vsel %vm414_vm8, %v410_v42, inf }
 0x4a8   :  { %416 = vmin.xlane.f32.xlu0 %v415_v44  ;;  %v494_v17 = vcvt.s32.f32 %v492_v63 }
 0x4a9   :  { %v427_v2 = vpop.xlane.xlu1 %426  ;;  %v441_v56 = vpop.xlane.xlu0 %440 }
 0x4aa   :  { %vm428_vm9 = vcmp.eq.f32.partialorder %v425_v28, %v427_v2  ;;  %vm442_vm10 = vcmp.eq.f32.partialorder %v439_v13, %v441_v56  ;;  %v506_v28 = vand.u32 65535, %v407_v35  ;;  %v433_v22 = vcvt.f32.s32 %v427_v2 }
 0x4ab   :  { %v429_v50 = vsel %vm428_vm9, %v424_v15, inf  ;;  %v443_v48 = vsel %vm442_vm10, %v438_v58, inf  ;;  %v447_v38 = vcvt.f32.s32 %v441_v56 }
 0x4ac   :  { %430 = vmin.xlane.f32.xlu1 %v429_v50  ;;  %444 = vmin.xlane.f32.xlu0 %v443_v48  ;;  %v508_v14 = vcvt.s32.f32 %v506_v28  ;;  %v434_v45 = vshll.u32 %v433_v22, 16 }
 0x4ad   :  { %v455_v3 = vpop.xlane.xlu1 %454  ;;  %v469_v16 = vpop.xlane.xlu0 %468  ;;  %v448_v46 = vshll.u32 %v447_v38, 16 }
 0x4ae   :  { %vm456_vm11 = vcmp.eq.f32.partialorder %v453_v26, %v455_v3  ;;  %vm470_vm12 = vcmp.eq.f32.partialorder %v467_v25, %v469_v16  ;;  %v420_v25 = vshll.u32 %v419_v7, 16  ;;  %v461_v35 = vcvt.f32.s32 %v455_v3 }
 0x4af   :  { %v457_v20 = vsel %vm456_vm11, %v452_v11, inf  ;;  %v471_v21 = vsel %vm470_vm12, %v466_v19, inf }
 0x4b0   :  { %458 = vmin.xlane.f32.xlu1 %v457_v20  ;;  %472 = vmin.xlane.f32.xlu0 %v471_v21  ;;  %v462_v56 = vshll.u32 %v461_v35, 16 }
 0x4b1   :  { %v483_v8 = vpop.xlane.xlu1 %482  ;;  %v497_v12 = vpop.xlane.xlu0 %496 }
 0x4b2   :  { %vm484_vm13 = vcmp.eq.f32.partialorder %v481_v31, %v483_v8  ;;  %vm498_vm14 = vcmp.eq.f32.partialorder %v495_v34, %v497_v12  ;;  %v475_v31 = vcvt.f32.s32 %v469_v16  ;;  %v489_v58 = vcvt.f32.s32 %v483_v8 }
 0x4b3   :  { %v485_v13 = vsel %vm484_vm13, %v480_v61, inf  ;;  %v499_v24 = vsel %vm498_vm14, %v494_v17, inf  ;;  %v503_v59 = vcvt.f32.s32 %v497_v12 }
 0x4b4   :  { %486 = vmin.xlane.f32.xlu1 %v485_v13  ;;  %500 = vmin.xlane.f32.xlu0 %v499_v24  ;;  %v476_v15 = vshll.u32 %v475_v31, 16  ;;  %v490_v62 = vshll.u32 %v489_v58, 16 }
 0x4b5   :  { %v511_v29 = vpop.xlane.xlu1 %510  ;;  %v504_v63 = vshll.u32 %v503_v59, 16 }
 0x4b6   :  { %vm512_vm15 = vcmp.eq.f32.partialorder %v509_v37, %v511_v29  ;;  %v517_v20 = vcvt.f32.s32 %v511_v29 }
 0x4b7   :  { %v513_v6 = vsel %vm512_vm15, %v508_v14, inf }
 0x4b8   :  { %514 = vmin.xlane.f32.xlu1 %v513_v6  ;;  %v518_v24 = vshll.u32 %v517_v20, 16 }
 0x535   :  { %v417_v26 = vpop.xlane.xlu0 %416 }
 0x536   :  { %v418_v27 = vcvt.f32.s32 %v417_v26 }
 0x538   :  { %v421_v36 = vadd.s32 %v420_v25, %v418_v27 }
 0x539   :  { %v431_v34 = vpop.xlane.xlu1 %430  ;;  %v445_v42 = vpop.xlane.xlu0 %444 }
 0x53a   :  { %v432_v43 = vcvt.f32.s32 %v431_v34  ;;  %v446_v44 = vcvt.f32.s32 %v445_v42  ;;  %vm520_vm0 = vcmp.eq.s32.totalorder %v858_v9, %v421_v36 }
 0x53b   :  { %v1068_v37 = vsel %vm520_vm0, -inf, %v982_v52 }
 0x53c   :  { %v435_v40 = vadd.s32 %v434_v45, %v432_v43  ;;  %v449_v2 = vadd.s32 %v448_v46, %v446_v44  ;;  %536 = vmax.xlane.f32.xlu0 %v1068_v37 }
 0x53d   :  { %v459_v18 = vpop.xlane.xlu1 %458  ;;  %v473_v50 = vpop.xlane.xlu0 %472 }
 0x53e   :  { %v460_v48 = vcvt.f32.s32 %v459_v18  ;;  %v474_v3 = vcvt.f32.s32 %v473_v50  ;;  %vm521_vm1 = vcmp.eq.s32.totalorder %v858_v9, %v435_v40  ;;  %vm522_vm2 = vcmp.eq.s32.totalorder %v858_v9, %v449_v2 }
 0x53f   :  { %v1074_v16 = vsel %vm521_vm1, -inf, %v988_v23  ;;  %v1077_v52 = vsel %vm522_vm2, -inf, %v991_v41 }
 0x540   :  { %v463_v11 = vadd.s32 %v462_v56, %v460_v48  ;;  %v477_v19 = vadd.s32 %v476_v15, %v474_v3  ;;  %538 = vmax.xlane.f32.xlu1 %v1074_v16  ;;  %540 = vmax.xlane.f32.xlu0 %v1077_v52 }
 0x541   :  { %v487_v21 = vpop.xlane.xlu1 %486  ;;  %v501_v8 = vpop.xlane.xlu0 %500 }
 0x542   :  { %v488_v12 = vcvt.f32.s32 %v487_v21  ;;  %v502_v61 = vcvt.f32.s32 %v501_v8  ;;  %vm523_vm3 = vcmp.eq.s32.totalorder %v858_v9, %v463_v11  ;;  %vm524_vm4 = vcmp.eq.s32.totalorder %v858_v9, %v477_v19 }
 0x543   :  { %v1084_v23 = vsel %vm523_vm3, -inf, %v998_v53  ;;  %v1087_v41 = vsel %vm524_vm4, -inf, %v1001_v0 }
 0x544   :  { %v491_v17 = vadd.s32 %v490_v62, %v488_v12  ;;  %v505_v28 = vadd.s32 %v504_v63, %v502_v61  ;;  %542 = vmax.xlane.f32.xlu1 %v1084_v23  ;;  %544 = vmax.xlane.f32.xlu0 %v1087_v41 }
 0x545   :  { %v515_v13 = vpop.xlane.xlu1 %514 }
 0x546   :  { %v516_v29 = vcvt.f32.s32 %v515_v13  ;;  %vm525_vm5 = vcmp.eq.s32.totalorder %v858_v9, %v491_v17  ;;  %vm526_vm6 = vcmp.eq.s32.totalorder %v858_v9, %v505_v28 }
 0x547   :  { %v1094_v14 = vsel %vm525_vm5, -inf, %v1008_v51  ;;  %v1097_v53 = vsel %vm526_vm6, -inf, %v1011_v1 }
 0x548   :  { %v519_v0 = vadd.s32 %v518_v24, %v516_v29  ;;  %546 = vmax.xlane.f32.xlu1 %v1094_v14  ;;  %548 = vmax.xlane.f32.xlu0 %v1097_v53 }
 0x54a   :  { %vm527_vm7 = vcmp.eq.s32.totalorder %v858_v9, %v519_v0 }
 0x54b   :  { %v1103_v6 = vsel %vm527_vm7, -inf, %v1017_v54 }
 0x54c   :  { %550 = vmax.xlane.f32.xlu1 %v1103_v6 }
 0x5c9   :  { %v537_v7 = vpop.xlane.xlu0 %536 }
 0x5ca   :  { %v1107_v22 = vadd.f32 %v537_v7, %v1022_v57  ;;  %vm560_vm8 = vcmp.eq.f32.partialorder %v1068_v37, %v537_v7 }
 0x5cb   :  { %v568_v51 = vsel %vm560_vm8, %v858_v9, 128 }
 0x5cc   :  { %v577_v1 = vshra.s32 %v568_v51, 16  ;;  %v576_v20 = vand.u32 65535, %v568_v51 }
 0x5cd   :  { %v539_v26 = vpop.xlane.xlu1 %538  ;;  %v541_v25 = vpop.xlane.xlu0 %540 }
 0x5ce   :  { %v1112_v38 = vadd.f32 %v539_v26, %v1030_v49  ;;  %vm561_vm9 = vcmp.eq.f32.partialorder %v1074_v16, %v539_v26  ;;  %v1116_v54 = vadd.f32 %v541_v25, %v1033_v10  ;;  %vm562_vm10 = vcmp.eq.f32.partialorder %v1077_v52, %v541_v25 }
 0x5cf   :  { %v569_v57 = vsel %vm561_vm9, %v858_v9, 128  ;;  %v570_v27 = vsel %vm562_vm10, %v858_v9, 128  ;;  %v579_v36 = vcvt.s32.f32 %v577_v1  ;;  %v578_v8 = vcvt.s32.f32 %v576_v20 }
 0x5d0   :  { %v591_v45 = vshra.s32 %v569_v57, 16  ;;  %v605_v35 = vshra.s32 %v570_v27, 16  ;;  %v590_v12 = vand.u32 65535, %v569_v57  ;;  %v604_v61 = vand.u32 65535, %v570_v27 }
 0x5d1   :  { %580 = vmin.xlane.f32.xlu0 %v579_v36  ;;  %v543_v31 = vpop.xlane.xlu1 %542  ;;  %v545_v34 = vpop.xlane.xlu0 %544 }
 0x5d2   :  { %v1122_v49 = vadd.f32 %v543_v31, %v1042_v55  ;;  %vm563_vm11 = vcmp.eq.f32.partialorder %v1084_v23, %v543_v31  ;;  %v1126_v10 = vadd.f32 %v545_v34, %v1045_v60  ;;  %vm564_vm12 = vcmp.eq.f32.partialorder %v1087_v41, %v545_v34 }
 0x5d3   :  { %v571_v42 = vsel %vm563_vm11, %v858_v9, 128  ;;  %v572_v46 = vsel %vm564_vm12, %v858_v9, 128  ;;  %v593_v43 = vcvt.s32.f32 %v591_v45  ;;  %v607_v44 = vcvt.s32.f32 %v605_v35 }
 0x5d4   :  { %v619_v40 = vshra.s32 %v571_v42, 16  ;;  %v633_v2 = vshra.s32 %v572_v46, 16  ;;  %v592_v24 = vcvt.s32.f32 %v590_v12  ;;  %v606_v29 = vcvt.s32.f32 %v604_v61 }
 0x5d5   :  { %594 = vmin.xlane.f32.xlu1 %v593_v43  ;;  %608 = vmin.xlane.f32.xlu0 %v607_v44  ;;  %v547_v56 = vpop.xlane.xlu1 %546  ;;  %v1131_v55 = vpop.xlane.xlu0 %548  ;;  %v618_v0 = vand.u32 65535, %v571_v42  ;;  %v632_v7 = vand.u32 65535, %v572_v46 }
 0x5d6   :  { %v1134_v15 = vadd.f32 %v547_v56, %v1054_v5  ;;  %vm565_vm13 = vcmp.eq.f32.partialorder %v1094_v14, %v547_v56  ;;  %vm566_vm14 = vcmp.eq.f32.partialorder %v1097_v53, %v1131_v55  ;;  %v621_v59 = vcvt.s32.f32 %v619_v40 }
 0x5d7   :  { %v573_v60 = vsel %vm565_vm13, %v858_v9, 128  ;;  %v574_v58 = vsel %vm566_vm14, %v858_v9, 128  ;;  %v635_v18 = vcvt.s32.f32 %v633_v2  ;;  %v620_v45 = vcvt.s32.f32 %v618_v0 }
 0x5d8   :  { %v647_v50 = vshra.s32 %v573_v60, 16  ;;  %v661_v48 = vshra.s32 %v574_v58, 16  ;;  %v634_v57 = vcvt.s32.f32 %v632_v7  ;;  %v646_v27 = vand.u32 65535, %v573_v60 }
 0x5d9   :  { %622 = vmin.xlane.f32.xlu1 %v621_v59  ;;  %636 = vmin.xlane.f32.xlu0 %v635_v18  ;;  %v1141_v3 = vpop.xlane.xlu1 %550 }
 0x5da   :  { %vm567_vm15 = vcmp.eq.f32.partialorder %v1103_v6, %v1141_v3  ;;  %v649_v5 = vcvt.s32.f32 %v647_v50  ;;  %v663_v11 = vcvt.s32.f32 %v661_v48  ;;  %v648_v46 = vcvt.s32.f32 %v646_v27 }
 0x5db   :  { %v575_v19 = vsel %vm567_vm15, %v858_v9, 128 }
 0x5dc   :  { %v675_v62 = vshra.s32 %v575_v19, 16 }
 0x5dd   :  { %650 = vmin.xlane.f32.xlu1 %v649_v5  ;;  %664 = vmin.xlane.f32.xlu0 %v663_v11 }
 0x5de   :  { %v677_v63 = vcvt.s32.f32 %v675_v62 }
 0x5e1   :  { %678 = vmin.xlane.f32.xlu1 %v677_v63 }
 0x65e   :  { %v581_v21 = vpop.xlane.xlu0 %580 }
 0x65f   :  { %vm582_vm0 = vcmp.eq.f32.partialorder %v579_v36, %v581_v21  ;;  %v660_v36 = vand.u32 65535, %v574_v58 }
 0x660   :  { %v583_v17 = vsel %vm582_vm0, %v578_v8, inf  ;;  %vm752_vm0 = vcmask 7168  }
 0x661   :  { %584 = vmin.xlane.f32.xlu0 %v583_v17 }
 0x662   :  { %v595_v28 = vpop.xlane.xlu1 %594  ;;  %v609_v13 = vpop.xlane.xlu0 %608 }
 0x663   :  { %vm596_vm1 = vcmp.eq.f32.partialorder %v593_v43, %v595_v28  ;;  %vm610_vm2 = vcmp.eq.f32.partialorder %v607_v44, %v609_v13  ;;  %v662_v43 = vcvt.s32.f32 %v660_v36  ;;  %v674_v44 = vand.u32 65535, %v575_v19 }
 0x664   :  { %v597_v1 = vsel %vm596_vm1, %v592_v24, inf  ;;  %v611_v26 = vsel %vm610_vm2, %v606_v29, inf  ;;  %v615_v62 = vcvt.f32.s32 %v609_v13 }
 0x665   :  { %598 = vmin.xlane.f32.xlu1 %v597_v1  ;;  %612 = vmin.xlane.f32.xlu0 %v611_v26  ;;  %v676_v60 = vcvt.s32.f32 %v674_v44 }
 0x666   :  { %v623_v51 = vpop.xlane.xlu1 %622  ;;  %v637_v25 = vpop.xlane.xlu0 %636  ;;  %v616_v17 = vshll.u32 %v615_v62, 16 }
 0x667   :  { %vm624_vm3 = vcmp.eq.f32.partialorder %v621_v59, %v623_v51  ;;  %vm638_vm4 = vcmp.eq.f32.partialorder %v635_v18, %v637_v25  ;;  %v587_v59 = vcvt.f32.s32 %v581_v21  ;;  %v601_v18 = vcvt.f32.s32 %v595_v28 }
 0x668   :  { %v625_v35 = vsel %vm624_vm3, %v620_v45, inf  ;;  %v639_v31 = vsel %vm638_vm4, %v634_v57, inf  ;;  %v629_v19 = vcvt.f32.s32 %v623_v51 }
 0x669   :  { %626 = vmin.xlane.f32.xlu1 %v625_v35  ;;  %640 = vmin.xlane.f32.xlu0 %v639_v31  ;;  %v588_v48 = vshll.u32 %v587_v59, 16  ;;  %v602_v12 = vshll.u32 %v601_v18, 16 }
 0x66a   :  { %v651_v34 = vpop.xlane.xlu1 %650  ;;  %v665_v42 = vpop.xlane.xlu0 %664  ;;  %v630_v28 = vshll.u32 %v629_v19, 16 }
 0x66b   :  { %vm652_vm5 = vcmp.eq.f32.partialorder %v649_v5, %v651_v34  ;;  %vm666_vm6 = vcmp.eq.f32.partialorder %v663_v11, %v665_v42  ;;  %v643_v5 = vcvt.f32.s32 %v637_v25  ;;  %v657_v13 = vcvt.f32.s32 %v651_v34 }
 0x66c   :  { %v653_v40 = vsel %vm652_vm5, %v648_v46, inf  ;;  %v667_v2 = vsel %vm666_vm6, %v662_v43, inf  ;;  %v671_v1 = vcvt.f32.s32 %v665_v42 }
 0x66d   :  { %654 = vmin.xlane.f32.xlu1 %v653_v40  ;;  %668 = vmin.xlane.f32.xlu0 %v667_v2  ;;  %v644_v7 = vshll.u32 %v643_v5, 16  ;;  %v658_v35 = vshll.u32 %v657_v13, 16  ;;  %v223_v5 = vadd.f32 %v975_v47, %v892_v33 }
 0x66e   :  { %v679_v56 = vpop.xlane.xlu1 %678  ;;  %v672_v31 = vshll.u32 %v671_v1, 16 }
 0x66f   :  { %vm680_vm7 = vcmp.eq.f32.partialorder %v677_v63, %v679_v56  ;;  %v685_v34 = vcvt.f32.s32 %v679_v56 }
 0x670   :  { %v681_v58 = vsel %vm680_vm7, %v676_v60, inf }
 0x671   :  { %682 = vmin.xlane.f32.xlu1 %v681_v58  ;;  %v686_v58 = vshll.u32 %v685_v34, 16 }
 0x6ee   :  { %v585_v50 = vpop.xlane.xlu0 %584 }
 0x6ef   :  { %v586_v20 = vcvt.f32.s32 %v585_v50 }
 0x6f1   :  { %v589_v8 = vadd.s32 %v588_v48, %v586_v20 }
 0x6f2   :  { %v599_v11 = vpop.xlane.xlu1 %598  ;;  %v613_v61 = vpop.xlane.xlu0 %612 }
 0x6f3   :  { %v600_v24 = vcvt.f32.s32 %v599_v11  ;;  %v614_v29 = vcvt.f32.s32 %v613_v61  ;;  %vm688_vm8 = vcmp.eq.s32.totalorder %v858_v9, %v589_v8 }
 0x6f4   :  { %v696_v63 = vsel %vm688_vm8, -inf, %v1068_v37 }
 0x6f5   :  { %v603_v0 = vadd.s32 %v602_v12, %v600_v24  ;;  %v617_v21 = vadd.s32 %v616_v17, %v614_v29  ;;  %704 = vmax.xlane.f32.xlu0 %v696_v63 }
 0x6f6   :  { %v627_v26 = vpop.xlane.xlu1 %626  ;;  %v641_v45 = vpop.xlane.xlu0 %640 }
 0x6f7   :  { %v628_v51 = vcvt.f32.s32 %v627_v26  ;;  %v642_v25 = vcvt.f32.s32 %v641_v45  ;;  %vm689_vm9 = vcmp.eq.s32.totalorder %v858_v9, %v603_v0  ;;  %vm690_vm10 = vcmp.eq.s32.totalorder %v858_v9, %v617_v21 }
 0x6f8   :  { %v697_v57 = vsel %vm689_vm9, -inf, %v1074_v16  ;;  %v698_v27 = vsel %vm690_vm10, -inf, %v1077_v52 }
 0x6f9   :  { %v631_v37 = vadd.s32 %v630_v28, %v628_v51  ;;  %v645_v36 = vadd.s32 %v644_v7, %v642_v25  ;;  %706 = vmax.xlane.f32.xlu1 %v697_v57  ;;  %708 = vmax.xlane.f32.xlu0 %v698_v27 }
 0x6fa   :  { %v655_v42 = vpop.xlane.xlu1 %654  ;;  %v669_v46 = vpop.xlane.xlu0 %668 }
 0x6fb   :  { %v656_v43 = vcvt.f32.s32 %v655_v42  ;;  %v670_v44 = vcvt.f32.s32 %v669_v46  ;;  %vm691_vm11 = vcmp.eq.s32.totalorder %v858_v9, %v631_v37  ;;  %vm692_vm12 = vcmp.eq.s32.totalorder %v858_v9, %v645_v36 }
 0x6fc   :  { %v699_v40 = vsel %vm691_vm11, -inf, %v1084_v23  ;;  %v700_v16 = vsel %vm692_vm12, -inf, %v1087_v41 }
 0x6fd   :  { %v659_v52 = vadd.s32 %v658_v35, %v656_v43  ;;  %v673_v2 = vadd.s32 %v672_v31, %v670_v44  ;;  %710 = vmax.xlane.f32.xlu1 %v699_v40  ;;  %712 = vmax.xlane.f32.xlu0 %v700_v16 }
 0x6fe   :  { %v683_v60 = vpop.xlane.xlu1 %682 }
 0x6ff   :  { %v684_v59 = vcvt.f32.s32 %v683_v60  ;;  %vm693_vm13 = vcmp.eq.s32.totalorder %v858_v9, %v659_v52  ;;  %vm694_vm14 = vcmp.eq.s32.totalorder %v858_v9, %v673_v2 }
 0x700   :  { %v701_v56 = vsel %vm693_vm13, -inf, %v1094_v14  ;;  %v702_v18 = vsel %vm694_vm14, -inf, %v1097_v53  ;;  %v222_v53 = vadd.f32 %v967_v39, %v890_v32  ;;  %v391_v39 = vadd.f32 %v1061_v30, %v223_v5 }
 0x701   :  { %v687_v50 = vadd.s32 %v686_v58, %v684_v59  ;;  %714 = vmax.xlane.f32.xlu1 %v701_v56  ;;  %716 = vmax.xlane.f32.xlu0 %v702_v18 }
 0x703   :  { %vm695_vm15 = vcmp.eq.s32.totalorder %v858_v9, %v687_v50 }
 0x704   :  { %v703_v23 = vsel %vm695_vm15, -inf, %v1103_v6  ;;  %v390_v6 = vadd.f32 %v1052_v4, %v222_v53 }
 0x705   :  { %718 = vmax.xlane.f32.xlu1 %v703_v23 }
 0x782   :  { %v705_v41 = vpop.xlane.xlu0 %704 }
 0x783   :  { %v720_v48 = vadd.f32 %v705_v41, %v1107_v22 }
 0x785   :  { %769 = vlog2.f32 %v720_v48 }
 0x786   :  { %v707_v62 = vpop.xlane.xlu1 %706  ;;  %v709_v20 = vpop.xlane.xlu0 %708 }
 0x787   :  { %v721_v8 = vadd.f32 %v707_v62, %v1112_v38  ;;  %v722_v14 = vadd.f32 %v709_v20, %v1116_v54  ;;  %v558_v38 = vadd.f32 %v1131_v55, %v390_v6 }
 0x789   :  { %771 = vlog2.f32 %v721_v8 }
 0x78a   :  { %773 = vlog2.f32 %v722_v14  ;;  %v711_v12 = vpop.xlane.xlu1 %710  ;;  %v713_v9 = vpop.xlane.xlu0 %712 }
 0x78b   :  { %v723_v19 = vadd.f32 %v711_v12, %v1122_v49  ;;  %v724_v22 = vadd.f32 %v713_v9, %v1126_v10  ;;  %v559_v49 = vadd.f32 %v1141_v3, %v391_v39 }
 0x78d   :  { %775 = vlog2.f32 %v723_v19 }
 0x78e   :  { %777 = vlog2.f32 %v724_v22  ;;  %v715_v54 = vpop.xlane.xlu1 %714  ;;  %v717_v11 = vpop.xlane.xlu0 %716 }
 0x78f   :  { %v770_v32 = vpop.eup %769  ;;  %v725_v61 = vadd.f32 %v715_v54, %v1134_v15  ;;  %v726_v17 = vadd.f32 %v717_v11, %v558_v38 }
 0x790   :  { %v729_v4 = vmul.f32 0.6931472, %v770_v32 }
 0x791   :  { %779 = vlog2.f32 %v725_v61 }
 0x792   :  { %v744_v10 = vsub.f32 0.0, %v729_v4  ;;  %781 = vlog2.f32 %v726_v17  ;;  %v719_v33 = vpop.xlane.xlu1 %718 }
 0x793   :  { %v772_v47 = vpop.eup %771  ;;  %v727_v55 = vadd.f32 %v719_v33, %v559_v49 }
 0x794   :  { %v774_v24 = vpop.eup %773  ;;  %753 = vst.msk [vmem:[%s1209_s1] sm:$0xff] %vm752_vm0, %v744_v10  ;;  %v731_v30 = vmul.f32 0.6931472, %v772_v47 }
 0x795   :  { %v733_v29 = vmul.f32 0.6931472, %v774_v24  ;;  %783 = vlog2.f32 %v727_v55 }
 0x796   :  { %v745_v15 = vsub.f32 0.0, %v731_v30 }
 0x797   :  { %v776_v63 = vpop.eup %775  ;;  %v746_v0 = vsub.f32 0.0, %v733_v29 }
 0x798   :  { %v778_v3 = vpop.eup %777  ;;  %754 = vst.msk [vmem:[%s1209_s1 + $0x8] sm:$0xff] %vm752_vm0, %v745_v15  ;;  %v735_v21 = vmul.f32 0.6931472, %v776_v63 }
 0x799   :  { %755 = vst.msk [vmem:[%s1209_s1 + $0x10] sm:$0xff] %vm752_vm0, %v746_v0  ;;  %v737_v28 = vmul.f32 0.6931472, %v778_v3 }
 0x79a   :  { %v747_v7 = vsub.f32 0.0, %v735_v21 }
 0x79b   :  { %v780_v13 = vpop.eup %779  ;;  %v748_v1 = vsub.f32 0.0, %v737_v28 }
 0x79c   :  { %v782_v26 = vpop.eup %781  ;;  %756 = vst.msk [vmem:[%s1209_s1 + $0x18] sm:$0xff] %vm752_vm0, %v747_v7  ;;  %v739_v45 = vmul.f32 0.6931472, %v780_v13 }
 0x79d   :  { %757 = vst.msk [vmem:[%s1209_s1 + $0x20] sm:$0xff] %vm752_vm0, %v748_v1  ;;  %v741_v51 = vmul.f32 0.6931472, %v782_v26 }
 0x79e   :  { %v749_v25 = vsub.f32 0.0, %v739_v45 }
 0x79f   :  { %v784_v57 = vpop.eup %783  ;;  %v750_v27 = vsub.f32 0.0, %v741_v51 }
 0x7a0   :  { %758 = vst.msk [vmem:[%s1209_s1 + $0x28] sm:$0xff] %vm752_vm0, %v749_v25  ;;  %v743_v37 = vmul.f32 0.6931472, %v784_v57 }
 0x7a1   :  { %759 = vst.msk [vmem:[%s1209_s1 + $0x30] sm:$0xff] %vm752_vm0, %v750_v27 }
 0x7a2   :  { %v751_v36 = vsub.f32 0.0, %v743_v37 }
 0x7a4   :  { %760 = vst.msk [vmem:[%s1209_s1 + $0x38] sm:$0xff] %vm752_vm0, %v751_v36 }
 0x7a5   :  { %765 = vsyncpa [#allocation3], 1 }

</bundles_post_ra>
